<compile_context>
chip_gen: v7x
topology: tpu7x:2x2x1
jax: 0.10.0
libtpu: 0.0.40
codegen_flags: <defaults>
</compile_context>

<pallas_src>
import functools
import math
import warnings

import jax
import jax.numpy as jnp
from jax.experimental import pallas as pl
from jax.experimental.pallas import tpu as pltpu


_TARGET_DMA_CHUNK_BYTES = 2 * 1024 * 1024   # ~2 MiB per HBM->HBM chunk
_MAX_OUTSTANDING_DMAS = 32                  # cap total in-flight descriptors
_STRIDED_OVERWRITE_MIN_BATCH = 9            # per-batch DMAs are fine for B <= 8
_STRIDED_OVERWRITE_MAX_SLAB_BYTES = 64 * 1024


def _sublane_pack(dtype):
    """Rows per packed sublane group: 8 for f32, 16 for bf16, 32 for int8."""
    bits = jnp.dtype(dtype).itemsize * 8
    return max(1, (32 // bits) * 8)


def _warn_if_unaligned(name, value, dtype):
    pack = _sublane_pack(dtype)
    if value % pack != 0:
        warnings.warn(
            f"{name}={value} is not a multiple of the {jnp.dtype(dtype).name} "
            f"sublane pack ({pack}); DMA row offsets will cross (8,128) tile "
            f"boundaries and lose some HBM bandwidth. Consider padding the "
            f"prompt length.")


def _ceil_div(a, b):
    return -(-a // b)


# =============================================================================
# layer_num == 0 : genuine concatenation -> output (B, P+S, D), DMA-only
# =============================================================================
def _concat_dma_kernel(prompt_ref, x_hbm, o_hbm, sem, *,
                       prompt_len, seq_len, x_out_off, p_out_off, chunk_rows):
    """Pure-DMA concat along the sequence dim.

    prompt_ref: (1, P, D)    in VMEM (shared across batch)
    x_hbm:      (B, S, D)    in HBM (never touched by the core)
    o_hbm:      (B, P+S, D)  in HBM (written only via DMA)
    sem:        one DMA semaphore slot per issued copy
    """
    B = x_hbm.shape[0]
    copies = []
    idx = 0
    for b in range(B):  # B and chunk counts are static -> fully unrolled.
        # Prompt slab: VMEM -> HBM.
        cp = pltpu.make_async_copy(
            prompt_ref,
            o_hbm.at[pl.ds(b, 1), pl.ds(p_out_off, prompt_len), :],
            sem.at[idx])
        cp.start()
        copies.append(cp)
        idx += 1
        # x rows: HBM -> HBM into the shifted output region, chunked so that
        # several DMAs are in flight (saturates HBM, esp. on v7x) without any
        # VMEM staging.
        off = 0
        while off < seq_len:
            rows = min(chunk_rows, seq_len - off)
            cp = pltpu.make_async_copy(
                x_hbm.at[pl.ds(b, 1), pl.ds(off, rows), :],
                o_hbm.at[pl.ds(b, 1), pl.ds(x_out_off + off, rows), :],
                sem.at[idx])
            cp.start()
            copies.append(cp)
            idx += 1
            off += rows
    for cp in copies:
        cp.wait()


def _concat_prompt(x, prompt_token, attach_front):
    B, S, D = x.shape
    P = prompt_token.shape[1]
    out_seq = P + S
    dtype = x.dtype

    _warn_if_unaligned("prompt_length", P, dtype)
    if not attach_front:
        _warn_if_unaligned("seq_len (prompt append offset)", S, dtype)

    # Pick chunk_rows so each HBM->HBM DMA moves ~2 MiB (amortizes descriptor
    # cost) while the total descriptor count stays modest (issue tail goes
    # through the single vector-misc slot).
    row_bytes = D * jnp.dtype(dtype).itemsize
    chunk_rows = max(1, _TARGET_DMA_CHUNK_BYTES // max(1, row_bytes))
    n_chunks = _ceil_div(S, chunk_rows)
    max_chunks = max(1, (_MAX_OUTSTANDING_DMAS // max(1, B)) - 1)
    if n_chunks > max_chunks:
        chunk_rows = _ceil_div(S, max_chunks)
        n_chunks = _ceil_div(S, chunk_rows)
    total_dmas = B * (n_chunks + 1)

    if attach_front:
        p_out_off, x_out_off = 0, P
    else:
        p_out_off, x_out_off = S, 0

    kernel = functools.partial(
        _concat_dma_kernel, prompt_len=P, seq_len=S,
        x_out_off=x_out_off, p_out_off=p_out_off, chunk_rows=chunk_rows)

    return pl.pallas_call(
        kernel,
        out_shape=jax.ShapeDtypeStruct((B, out_seq, D), dtype),
        in_specs=[
            pl.BlockSpec(memory_space=pltpu.MemorySpace.VMEM),  # prompt -> VMEM
            pl.BlockSpec(memory_space=pl.ANY),                  # x stays in HBM
        ],
        out_specs=pl.BlockSpec(memory_space=pl.ANY),            # DMA-written only
        scratch_shapes=[pltpu.SemaphoreType.DMA((total_dmas,))],
    )(prompt_token, x)


# =============================================================================
# layer_num > 0 : in-place overwrite of a P-token slab (output shape == x)
# =============================================================================
def _overwrite_kernel_per_batch(prompt_ref, x_hbm, o_hbm, sem, *,
                                seq_off, prompt_len):
    """x is aliased to the output; only the (1,P,D) prompt slab per batch
    element is DMA'd VMEM -> HBM.  All other rows stay untouched in HBM."""
    del x_hbm  # its untouched rows *are* the output (input/output alias)
    B = o_hbm.shape[0]
    copies = []
    for b in range(B):  # B is static -> unrolled; issue all DMAs, then wait.
        cp = pltpu.make_async_copy(
            prompt_ref,
            o_hbm.at[pl.ds(b, 1), pl.ds(seq_off, prompt_len), :],
            sem.at[b])
        cp.start()
        copies.append(cp)
    for cp in copies:
        cp.wait()


def _overwrite_kernel_strided(prompt_ref, x_hbm, o_hbm, bcast_ref, sem, *,
                              seq_off, prompt_len):
    """Large-B variant: broadcast the prompt to (B,P,D) in VMEM and write the
    whole slab with ONE strided DMA (descriptor count B -> 1)."""
    del x_hbm
    bcast_ref[...] = jnp.broadcast_to(prompt_ref[...], bcast_ref.shape)
    cp = pltpu.make_async_copy(
        bcast_ref,
        o_hbm.at[:, pl.ds(seq_off, prompt_len), :],
        sem)
    cp.start()
    cp.wait()


def _overwrite_prompt_inplace(x, prompt_token, attach_front):
    B, S, D = x.shape
    P = prompt_token.shape[1]
    if P <= 0 or S < P:
        raise ValueError(
            f"layer_num > 0 requires 0 < prompt_length <= seq_len, "
            f"got P={P}, S={S}")
    seq_off = 0 if attach_front else S - P
    dtype = x.dtype

    _warn_if_unaligned("prompt_length", P, dtype)
    if not attach_front:
        _warn_if_unaligned("seq offset (S - P)", seq_off, dtype)

    slab_bytes = P * D * jnp.dtype(dtype).itemsize
    use_strided = (B >= _STRIDED_OVERWRITE_MIN_BATCH
                   and slab_bytes <= _STRIDED_OVERWRITE_MAX_SLAB_BYTES)

    if use_strided:
        kernel = functools.partial(
            _overwrite_kernel_strided, seq_off=seq_off, prompt_len=P)
        scratch = [pltpu.VMEM((B, P, D), dtype),
                   pltpu.SemaphoreType.DMA(())]
    else:
        kernel = functools.partial(
            _overwrite_kernel_per_batch, seq_off=seq_off, prompt_len=P)
        scratch = [pltpu.SemaphoreType.DMA((B,))]

    # x (input index 1) is aliased to output 0.  NOTE: the ~B*P*D byte count
    # only holds if the caller donates x (jax.jit(..., donate_argnums=...) —
    # see make_donated_prompt_forward); otherwise XLA inserts one defensive
    # full copy of x.
    return pl.pallas_call(
        kernel,
        out_shape=jax.ShapeDtypeStruct((B, S, D), dtype),
        in_specs=[
            pl.BlockSpec(memory_space=pltpu.MemorySpace.VMEM),  # prompt -> VMEM
            pl.BlockSpec(memory_space=pl.ANY),                  # x stays in HBM
        ],
        out_specs=pl.BlockSpec(memory_space=pl.ANY),            # DMA-written only
        scratch_shapes=scratch,
        input_output_aliases={1: 0},
    )(prompt_token, x)


# =============================================================================
# Public forward (matches PromptModule.forward)
# =============================================================================
def prompt_forward(x, prompt_token, *, layer_num, attach_front=True):
    """JAX/Pallas equivalent of PromptModule.forward.

    x:            (B, S, D)
    prompt_token: (1, P, D)

    For layer_num > 0, donate x (see make_donated_prompt_forward) to get a
    true in-place update; otherwise XLA copies x defensively.
    """
    if layer_num == 0:
        return _concat_prompt(x, prompt_token, attach_front)
    return _overwrite_prompt_inplace(x, prompt_token, attach_front)


def make_donated_prompt_forward(*, layer_num, attach_front=True):
    """jit-compiled forward that donates x so the layer_num>0 alias path is a
    true in-place update (bytes moved ~ B*P*D, not ~2*B*S*D)."""
    fn = functools.partial(prompt_forward, layer_num=layer_num,
                           attach_front=attach_front)
    return jax.jit(fn, donate_argnums=(0,))


def init_prompt_token(key, prompt_length, dim, dtype=jnp.float32):
    """xavier_uniform_ on a (1, prompt_length, dim) parameter:
    fan_in = prompt_length*dim, fan_out = 1*dim (torch semantics)."""
    fan_in = prompt_length * dim
    fan_out = 1 * dim
    bound = math.sqrt(3.0) * math.sqrt(2.0 / (fan_in + fan_out))
    return jax.random.uniform(
        key, (1, prompt_length, dim), dtype=dtype, minval=-bound, maxval=bound)


def prompt_forward_ref(x, prompt_token, *, layer_num, attach_front=True):
    """Pure-JAX reference of the PyTorch forward."""
    B, S, _ = x.shape
    P = prompt_token.shape[1]
    pt = jnp.broadcast_to(prompt_token, (B, P, prompt_token.shape[2]))
    if layer_num == 0:
        return (jnp.concatenate((pt, x), axis=1) if attach_front
                else jnp.concatenate((x, pt), axis=1))
    if attach_front:
        return jnp.concatenate((pt, x[:, P:, :]), axis=1)
    return jnp.concatenate((x[:, : S - P, :], pt), axis=1)


# TODO(synk): patch_attention_mask / extract are simple slicing helpers outside
# forward(); they are not implemented as kernels here.

if __name__ == "__main__":
    key = jax.random.PRNGKey(0)
    k_prompt, k_x = jax.random.split(key)

    # Small but tile-friendly shapes: D multiple of 128 (lane), P multiple of 8
    # (f32 sublane pack), and S > P so the layer_num > 0 path is non-degenerate.
    B, S, D = 2, 16, 128
    prompt_length = 8

    prompt_token = init_prompt_token(k_prompt, prompt_length, D)
    x = jax.random.normal(k_x, (B, S, D), dtype=jnp.float32)

    ok = True
    for layer_num in (0, 1):
        for attach_front in (True, False):
            out = prompt_forward(
                x, prompt_token, layer_num=layer_num, attach_front=attach_front)
            out = jax.block_until_ready(out)
            ref = prompt_forward_ref(
                x, prompt_token, layer_num=layer_num, attach_front=attach_front)
            if out.shape != ref.shape or not jnp.allclose(out, ref):
                ok = False

    # Exercise the donated (true in-place) layer>0 path once.
    with warnings.catch_warnings():
        warnings.simplefilter("ignore")
        fwd = make_donated_prompt_forward(layer_num=1, attach_front=True)
        x_don = x + 0.0  # fresh buffer; donated below and never reused
        out = jax.block_until_ready(fwd(x_don, prompt_token))
        ref = prompt_forward_ref(x, prompt_token, layer_num=1, attach_front=True)
        if out.shape != ref.shape or not jnp.allclose(out, ref):
            ok = False

    if ok:
        print("KERNEL_OK")
</pallas_src>

<mosaic_0001>
module attributes {stable_mosaic.version = 11 : i64} {
  func.func @_concat_dma_kernel(%arg0: memref<1x8x128xf32, #tpu.memory_space<vmem>>, %arg1: memref<2x16x128xf32, #tpu.memory_space<any>>, %arg2: memref<2x24x128xf32, #tpu.memory_space<any>>, %arg3: memref<4x!tpu.dma_semaphore, #tpu.memory_space<semaphore_mem>>) attributes {dimension_semantics = [], scalar_prefetch = 0 : i64, scratch_operands = 1 : i64, tpu.core_type = #tpu.core_type<tc>} {
    %c0_i32 = arith.constant 0 : i32
    %c0_i32_0 = arith.constant 0 : i32
    %c0_i32_1 = arith.constant 0 : i32
    %c0_i32_2 = arith.constant 0 : i32
    %0 = tpu.memref_slice %arg2[%c0_i32_0, %c0_i32_1, %c0_i32_2] : memref<2x24x128xf32, #tpu.memory_space<any>> -> memref<1x8x128xf32, #tpu.memory_space<any>>
    %1 = tpu.memref_slice %arg3[%c0_i32] : memref<4x!tpu.dma_semaphore, #tpu.memory_space<semaphore_mem>> -> memref<1x!tpu.dma_semaphore, #tpu.memory_space<semaphore_mem>>
    %2 = tpu.memref_squeeze %1 : memref<1x!tpu.dma_semaphore, #tpu.memory_space<semaphore_mem>> -> memref<!tpu.dma_semaphore, #tpu.memory_space<semaphore_mem>>
    tpu.enqueue_dma source(%arg0 : memref<1x8x128xf32, #tpu.memory_space<vmem>>) target(%0 : memref<1x8x128xf32, #tpu.memory_space<any>>) target_semaphore(%2 : memref<!tpu.dma_semaphore, #tpu.memory_space<semaphore_mem>>)
    %c1_i32 = arith.constant 1 : i32
    %c0_i32_3 = arith.constant 0 : i32
    %c0_i32_4 = arith.constant 0 : i32
    %c0_i32_5 = arith.constant 0 : i32
    %3 = tpu.memref_slice %arg1[%c0_i32_3, %c0_i32_4, %c0_i32_5] : memref<2x16x128xf32, #tpu.memory_space<any>> -> memref<1x16x128xf32, #tpu.memory_space<any>>
    %c0_i32_6 = arith.constant 0 : i32
    %c8_i32 = arith.constant 8 : i32
    %c0_i32_7 = arith.constant 0 : i32
    %4 = tpu.memref_slice %arg2[%c0_i32_6, %c8_i32, %c0_i32_7] : memref<2x24x128xf32, #tpu.memory_space<any>> -> memref<1x16x128xf32, #tpu.memory_space<any>>
    %5 = tpu.memref_slice %arg3[%c1_i32] : memref<4x!tpu.dma_semaphore, #tpu.memory_space<semaphore_mem>> -> memref<1x!tpu.dma_semaphore, #tpu.memory_space<semaphore_mem>>
    %6 = tpu.memref_squeeze %5 : memref<1x!tpu.dma_semaphore, #tpu.memory_space<semaphore_mem>> -> memref<!tpu.dma_semaphore, #tpu.memory_space<semaphore_mem>>
    tpu.enqueue_dma source(%3 : memref<1x16x128xf32, #tpu.memory_space<any>>) target(%4 : memref<1x16x128xf32, #tpu.memory_space<any>>) target_semaphore(%6 : memref<!tpu.dma_semaphore, #tpu.memory_space<semaphore_mem>>)
    %c2_i32 = arith.constant 2 : i32
    %c1_i32_8 = arith.constant 1 : i32
    %c0_i32_9 = arith.constant 0 : i32
    %c0_i32_10 = arith.constant 0 : i32
    %7 = tpu.memref_slice %arg2[%c1_i32_8, %c0_i32_9, %c0_i32_10] : memref<2x24x128xf32, #tpu.memory_space<any>> -> memref<1x8x128xf32, #tpu.memory_space<any>>
    %8 = tpu.memref_slice %arg3[%c2_i32] : memref<4x!tpu.dma_semaphore, #tpu.memory_space<semaphore_mem>> -> memref<1x!tpu.dma_semaphore, #tpu.memory_space<semaphore_mem>>
    %9 = tpu.memref_squeeze %8 : memref<1x!tpu.dma_semaphore, #tpu.memory_space<semaphore_mem>> -> memref<!tpu.dma_semaphore, #tpu.memory_space<semaphore_mem>>
    tpu.enqueue_dma source(%arg0 : memref<1x8x128xf32, #tpu.memory_space<vmem>>) target(%7 : memref<1x8x128xf32, #tpu.memory_space<any>>) target_semaphore(%9 : memref<!tpu.dma_semaphore, #tpu.memory_space<semaphore_mem>>)
    %c3_i32 = arith.constant 3 : i32
    %c1_i32_11 = arith.constant 1 : i32
    %c0_i32_12 = arith.constant 0 : i32
    %c0_i32_13 = arith.constant 0 : i32
    %10 = tpu.memref_slice %arg1[%c1_i32_11, %c0_i32_12, %c0_i32_13] : memref<2x16x128xf32, #tpu.memory_space<any>> -> memref<1x16x128xf32, #tpu.memory_space<any>>
    %c1_i32_14 = arith.constant 1 : i32
    %c8_i32_15 = arith.constant 8 : i32
    %c0_i32_16 = arith.constant 0 : i32
    %11 = tpu.memref_slice %arg2[%c1_i32_14, %c8_i32_15, %c0_i32_16] : memref<2x24x128xf32, #tpu.memory_space<any>> -> memref<1x16x128xf32, #tpu.memory_space<any>>
    %12 = tpu.memref_slice %arg3[%c3_i32] : memref<4x!tpu.dma_semaphore, #tpu.memory_space<semaphore_mem>> -> memref<1x!tpu.dma_semaphore, #tpu.memory_space<semaphore_mem>>
    %13 = tpu.memref_squeeze %12 : memref<1x!tpu.dma_semaphore, #tpu.memory_space<semaphore_mem>> -> memref<!tpu.dma_semaphore, #tpu.memory_space<semaphore_mem>>
    tpu.enqueue_dma source(%10 : memref<1x16x128xf32, #tpu.memory_space<any>>) target(%11 : memref<1x16x128xf32, #tpu.memory_space<any>>) target_semaphore(%13 : memref<!tpu.dma_semaphore, #tpu.memory_space<semaphore_mem>>)
    %c0_i32_17 = arith.constant 0 : i32
    %c0_i32_18 = arith.constant 0 : i32
    %c0_i32_19 = arith.constant 0 : i32
    %c0_i32_20 = arith.constant 0 : i32
    %14 = tpu.memref_slice %arg2[%c0_i32_18, %c0_i32_19, %c0_i32_20] : memref<2x24x128xf32, #tpu.memory_space<any>> -> memref<1x8x128xf32, #tpu.memory_space<any>>
    %15 = tpu.memref_slice %arg3[%c0_i32_17] : memref<4x!tpu.dma_semaphore, #tpu.memory_space<semaphore_mem>> -> memref<1x!tpu.dma_semaphore, #tpu.memory_space<semaphore_mem>>
    %16 = tpu.memref_squeeze %15 : memref<1x!tpu.dma_semaphore, #tpu.memory_space<semaphore_mem>> -> memref<!tpu.dma_semaphore, #tpu.memory_space<semaphore_mem>>
    tpu.wait_dma2 semaphore(%16 : memref<!tpu.dma_semaphore, #tpu.memory_space<semaphore_mem>>) src(%arg0 : memref<1x8x128xf32, #tpu.memory_space<vmem>>) dst(%14 : memref<1x8x128xf32, #tpu.memory_space<any>>)
    %c1_i32_21 = arith.constant 1 : i32
    %c0_i32_22 = arith.constant 0 : i32
    %c0_i32_23 = arith.constant 0 : i32
    %c0_i32_24 = arith.constant 0 : i32
    %17 = tpu.memref_slice %arg1[%c0_i32_22, %c0_i32_23, %c0_i32_24] : memref<2x16x128xf32, #tpu.memory_space<any>> -> memref<1x16x128xf32, #tpu.memory_space<any>>
    %c0_i32_25 = arith.constant 0 : i32
    %c8_i32_26 = arith.constant 8 : i32
    %c0_i32_27 = arith.constant 0 : i32
    %18 = tpu.memref_slice %arg2[%c0_i32_25, %c8_i32_26, %c0_i32_27] : memref<2x24x128xf32, #tpu.memory_space<any>> -> memref<1x16x128xf32, #tpu.memory_space<any>>
    %19 = tpu.memref_slice %arg3[%c1_i32_21] : memref<4x!tpu.dma_semaphore, #tpu.memory_space<semaphore_mem>> -> memref<1x!tpu.dma_semaphore, #tpu.memory_space<semaphore_mem>>
    %20 = tpu.memref_squeeze %19 : memref<1x!tpu.dma_semaphore, #tpu.memory_space<semaphore_mem>> -> memref<!tpu.dma_semaphore, #tpu.memory_space<semaphore_mem>>
    tpu.wait_dma2 semaphore(%20 : memref<!tpu.dma_semaphore, #tpu.memory_space<semaphore_mem>>) src(%17 : memref<1x16x128xf32, #tpu.memory_space<any>>) dst(%18 : memref<1x16x128xf32, #tpu.memory_space<any>>)
    %c2_i32_28 = arith.constant 2 : i32
    %c1_i32_29 = arith.constant 1 : i32
    %c0_i32_30 = arith.constant 0 : i32
    %c0_i32_31 = arith.constant 0 : i32
    %21 = tpu.memref_slice %arg2[%c1_i32_29, %c0_i32_30, %c0_i32_31] : memref<2x24x128xf32, #tpu.memory_space<any>> -> memref<1x8x128xf32, #tpu.memory_space<any>>
    %22 = tpu.memref_slice %arg3[%c2_i32_28] : memref<4x!tpu.dma_semaphore, #tpu.memory_space<semaphore_mem>> -> memref<1x!tpu.dma_semaphore, #tpu.memory_space<semaphore_mem>>
    %23 = tpu.memref_squeeze %22 : memref<1x!tpu.dma_semaphore, #tpu.memory_space<semaphore_mem>> -> memref<!tpu.dma_semaphore, #tpu.memory_space<semaphore_mem>>
    tpu.wait_dma2 semaphore(%23 : memref<!tpu.dma_semaphore, #tpu.memory_space<semaphore_mem>>) src(%arg0 : memref<1x8x128xf32, #tpu.memory_space<vmem>>) dst(%21 : memref<1x8x128xf32, #tpu.memory_space<any>>)
    %c3_i32_32 = arith.constant 3 : i32
    %c1_i32_33 = arith.constant 1 : i32
    %c0_i32_34 = arith.constant 0 : i32
    %c0_i32_35 = arith.constant 0 : i32
    %24 = tpu.memref_slice %arg1[%c1_i32_33, %c0_i32_34, %c0_i32_35] : memref<2x16x128xf32, #tpu.memory_space<any>> -> memref<1x16x128xf32, #tpu.memory_space<any>>
    %c1_i32_36 = arith.constant 1 : i32
    %c8_i32_37 = arith.constant 8 : i32
    %c0_i32_38 = arith.constant 0 : i32
    %25 = tpu.memref_slice %arg2[%c1_i32_36, %c8_i32_37, %c0_i32_38] : memref<2x24x128xf32, #tpu.memory_space<any>> -> memref<1x16x128xf32, #tpu.memory_space<any>>
    %26 = tpu.memref_slice %arg3[%c3_i32_32] : memref<4x!tpu.dma_semaphore, #tpu.memory_space<semaphore_mem>> -> memref<1x!tpu.dma_semaphore, #tpu.memory_space<semaphore_mem>>
    %27 = tpu.memref_squeeze %26 : memref<1x!tpu.dma_semaphore, #tpu.memory_space<semaphore_mem>> -> memref<!tpu.dma_semaphore, #tpu.memory_space<semaphore_mem>>
    tpu.wait_dma2 semaphore(%27 : memref<!tpu.dma_semaphore, #tpu.memory_space<semaphore_mem>>) src(%24 : memref<1x16x128xf32, #tpu.memory_space<any>>) dst(%25 : memref<1x16x128xf32, #tpu.memory_space<any>>)
    return
  }
}

</mosaic_0001>

<bundles_post_ra>
// kernel: tpu_custom_call.1
= control target key start
LH: loop header
LB: loop body
LE: loop exit
PB: predicated region body
PF: predicated region fallthrough
CT: control target
= control target key end

     0   :  { %7 = vsyncpa [#allocation4], 0  ;;  %s205_s9 = smov [#allocation3]   ;;  %s287_s0 = inlined_call_operand.hbm [shape: f32[1,8,128], index: 0, kind: input, shape index: {}]   ;;  %s288_s1 = inlined_call_operand.hbm [shape: f32[2,16,128], index: 1, kind: input, shape index: {}]   ;;  %s289_s2 = inlined_call_operand.hbm [shape: f32[2,24,128], index: 2, kind: output, shape index: {}]  }
   0x1   :  { %s14_s10 = sshll.u32 %s205_s9, 4  ;;  %s126_s13 = scalar_lea.hbm %s287_s0, 128  ;;  %s226_s10 = int_to_ptr.vmem [resolvable:$true] %s14_s10 }
   0x2   :  { %p127_p0 = scmp.ne.s32.totalorder %s287_s0, %s126_s13  ;;  %p130_p1 = scmp.lt.u32.totalorder %s126_s13, %s287_s0 }
   0x4   :  { %p132_p2 = pnand %p130_p1, %p127_p0 }
   0x6   :  { %135 = shalt.err (!%p132_p2)
}
   0x7   :  { %s136_s18 = scalar_lea.vmem %s226_s10, 128  ;;  %p141_p4 = scmp.lt.s32.totalorder %s226_s10, %s226_s10 }
   0x8   :  { %p137_p3 = scmp.ne.s32.totalorder %s226_s10, %s136_s18  ;;  %p142_p5 = scmp.lt.s32.totalorder %s136_s18, %s136_s18 }
   0xa   :  { %p143_p6 = por %p142_p5, %p141_p4 }
   0xc   :  { %p241_p7 = pnand %p143_p6, %p137_p3 }
   0xe   :  { %147 = shalt.err (!%p241_p7)
}
   0xf   :  { %17 = dma.hbm_to_vmem [thread:$0]  %s287_s0, 128, %s226_s10, [#allocation4]  }
  0x10   :  { %195 = dma.done.wait [#allocation4], 128  }
  0x11   :  { %196 = vsyncadd [#allocation4], 4294967168  ;;  %s32_s24 = scalar_lea.hbm %s289_s2, 128 }
  0x12   :  { %159 = shalt.err (!%p241_p7)  }
  0x13   :  { %p161_p8 = scmp.ne.s32.totalorder %s289_s2, %s32_s24  ;;  %s162_s29 = scalar_lea.hbm %s289_s2, 768 }
  0x14   :  { %p163_p9 = scmp.lt.u32.totalorder %s162_s29, %s32_s24  ;;  %p164_p10 = scmp.lt.u32.totalorder %s32_s24, %s289_s2 }
  0x16   :  { %p165_p11 = por %p164_p10, %p163_p9 }
  0x18   :  { %p166_p12 = pnand %p165_p11, %p161_p8 }
  0x1a   :  { %169 = shalt.err (!%p166_p12)  }
  0x1b   :  { %31 = dma.vmem_to_hbm [thread:$0]  %s226_s10, 128, %s289_s2, [#allocation2] }
  0x1c   :  { %s206_s5 = smov [#allocation2 + $0x1]   ;;  %s207_s6 = smov [#allocation9]  }
  0x1d   :  { %s208_s7 = smov 0   ;;  %s47_s13 = scalar_lea.hbm %s289_s2, 384 }
  0x1e   :  { %46 = dma.general %s288_s1, 256, %s32_s24, %s206_s5, %s207_s6, [#allocation10], %s208_s7, 0  }
  0x1f   :  { %s60_s16 = scalar_lea.hbm %s288_s1, 256 }
  0x20   :  { %181 = shalt.err (!%p241_p7)  }
  0x21   :  { %s194_s20 = scalar_lea.hbm %s289_s2, 512  ;;  %p185_p0 = scmp.lt.u32.totalorder %s47_s13, %s289_s2 }
  0x22   :  { %p183_p13 = scmp.ne.s32.totalorder %s47_s13, %s194_s20  ;;  %p186_p1 = scmp.lt.u32.totalorder %s162_s29, %s194_s20 }
  0x23   :  { %p188_p3 = scmp.lt.u32.totalorder %s194_s20, %s47_s13 }
  0x24   :  { %p187_p2 = por %p186_p1, %p185_p0 }
  0x26   :  { %p189_p4 = por %p188_p3, %p187_p2 }
  0x28   :  { %p190_p5 = pnand %p189_p4, %p183_p13 }
  0x2a   :  { %193 = shalt.err (!%p190_p5)  }
  0x2b   :  { %59 = dma.vmem_to_hbm [thread:$0]  %s226_s10, 128, %s47_s13, [#allocation2 + $0x2] }
  0x2c   :  { %s209_s1 = smov [#allocation2 + $0x3]   ;;  %s210_s19 = smov [#allocation13]  }
  0x2d   :  { %75 = dma.general %s60_s16, 256, %s194_s20, %s209_s1, %s210_s19, [#allocation14], %s208_s7, 0  }
  0x2e   :  { %197 = dma.done.wait [#allocation2], 128 }
  0x2f   :  { %198 = vsyncadd [#allocation2], 4294967168 }
  0x30   :  { %199 = dma.done.wait [#allocation2 + $0x1], 256 }
  0x31   :  { %200 = vsyncadd [#allocation2 + $0x1], 4294967040 }
  0x32   :  { %201 = dma.done.wait [#allocation2 + $0x2], 128 }
  0x33   :  { %202 = vsyncadd [#allocation2 + $0x2], 4294967168 }
  0x34   :  { %203 = dma.done.wait [#allocation2 + $0x3], 256 }
  0x35   :  { %204 = vsyncadd [#allocation2 + $0x3], 4294967040 }
  0x36   :  { %88 = vsyncpa [#allocation4], 1 }
  0x37   :  { %89 = vsyncmov [#allocation2] }
  0x3a   :  { %s90_s2 = vpop.sfrf %89 }
  0x3b   :  { %p116_p6 = scmp.ne.s32.totalorder %s90_s2, 0 }
  0x3d   :  { %94 = shalt.err (%p116_p6)  }
  0x3e   :  { %96 = vsyncmov [#allocation2 + $0x1] }
  0x41   :  { %s97_s23 = vpop.sfrf %96 }
  0x42   :  { %p117_p7 = scmp.ne.s32.totalorder %s97_s23, 0 }
  0x44   :  { %101 = shalt.err (%p117_p7)  }
  0x45   :  { %103 = vsyncmov [#allocation2 + $0x2] }
  0x48   :  { %s104_s10 = vpop.sfrf %103 }
  0x49   :  { %p118_p8 = scmp.ne.s32.totalorder %s104_s10, 0 }
  0x4b   :  { %108 = shalt.err (%p118_p8)  }
  0x4c   :  { %110 = vsyncmov [#allocation2 + $0x3] }
  0x4f   :  { %s111_s24 = vpop.sfrf %110 }
  0x50   :  { %p119_p9 = scmp.ne.s32.totalorder %s111_s24, 0 }
  0x52   :  { %115 = shalt.err (%p119_p9)  }

</bundles_post_ra>
